<compile_context>
chip_gen: v5e
topology: v5e:2x2
jax: 0.10.0
libtpu: 0.0.40
codegen_flags: <defaults>
</compile_context>

<pallas_src>
import jax
import jax.numpy as jnp
from jax.experimental import pallas as pl
from jax.experimental.pallas import tpu as pltpu


# ----------------------------- small helpers --------------------------------

def _cdiv(a, b):
    return (a + b - 1) // b


def _round_up(x, m):
    return _cdiv(x, m) * m


def _pick_tile(dim, preferred, quantum):
    """Largest multiple of `quantum` <= min(preferred, dim) that divides `dim`.
    Falls back to the full dim when it is not a multiple of `quantum`."""
    if dim % quantum != 0:
        return dim
    best = quantum
    t = quantum
    cap = min(preferred, dim)
    while t <= cap:
        if dim % t == 0:
            best = t
        t += quantum
    return best


def _tpu_caps():
    """Returns (vmem_capacity_bytes, device_kind_lowercase) with safe fallbacks."""
    vmem = 64 << 20            # conservative fallback (v7x per-TC capacity)
    kind = ""
    try:
        vmem = int(pltpu.get_tpu_info().vmem_capacity_bytes)
    except Exception:
        pass
    try:
        kind = jax.devices()[0].device_kind.lower()
    except Exception:
        pass
    return vmem, kind


# ------------------------------- kernels -------------------------------------

def _mlp_embedder_resident_kernel(x_ref, w1_ref, b1_ref, w2_ref, b2_ref, o_ref):
    # x_ref : (TM, in_dim_pad)   streamed over M (grid axis 0)
    # w1_ref: (in_dim_pad, H)    resident (constant index_map)
    # b1_ref: (1, H)             resident
    # w2_ref: (H, H)             resident
    # b2_ref: (1, H)             resident
    # o_ref : (TM, H)
    h = jnp.dot(x_ref[...], w1_ref[...], preferred_element_type=jnp.float32)
    h = h + b1_ref[...].astype(jnp.float32)
    h = h * jax.nn.sigmoid(h)                     # SiLU (EUP sigmoid + VPU mul)
    h = h.astype(w2_ref.dtype)                    # bf16 in production params
    o = jnp.dot(h, w2_ref[...], preferred_element_type=jnp.float32)
    o = o + b2_ref[...].astype(jnp.float32)
    o_ref[...] = o.astype(o_ref.dtype)


def _mlp_embedder_stream_kernel(x_ref, w1_ref, b1_ref, w2_ref, b2_ref, o_ref,
                                h_ref):
    # Streaming-W2 fallback (hidden too large to keep W2 VMEM-resident).
    # x_ref : (TM, in_dim_pad)   streamed over M (grid axis 0)
    # w1_ref: (in_dim_pad, H)    resident
    # b1_ref: (1, H)             resident
    # w2_ref: (H, TN)            streamed over N (grid axis 1, innermost)
    # b2_ref: (1, TN)            streamed over N
    # o_ref : (TM, TN)
    # h_ref : (TM, H)            VMEM scratch, persists across grid steps.
    @pl.when(pl.program_id(1) == 0)
    def _():
        h = jnp.dot(x_ref[...], w1_ref[...], preferred_element_type=jnp.float32)
        h = h + b1_ref[...].astype(jnp.float32)
        h = h * jax.nn.sigmoid(h)
        h_ref[...] = h.astype(h_ref.dtype)

    o = jnp.dot(h_ref[...], w2_ref[...], preferred_element_type=jnp.float32)
    o = o + b2_ref[...].astype(jnp.float32)
    o_ref[...] = o.astype(o_ref.dtype)


# --------------------------- parameter preparation ---------------------------

def prepare_mlp_embedder_params(w1, b1, w2, b2, param_dtype=None,
                                in_pad_multiple=128):
    """One-time parameter conversion (hoisted out of the per-call path).

    w1: (hidden, in_dim) torch layout, b1: (hidden,),
    w2: (hidden, hidden) torch layout, b2: (hidden,).

    Returns (W1 (in_dim_pad, hidden), b1 (1, hidden), W2 (hidden, hidden),
    b2 (1, hidden)).  in_dim is zero-padded to a multiple of `in_pad_multiple`
    so the in_layer contraction is lane-dense / MXU-aligned (the wrapper
    zero-pads x to match, so results are unchanged).

    In production pass param_dtype=jnp.bfloat16: v6e/v7x MXU peak is bf16 and it
    halves weight DMA and VMEM footprint.  (The test below keeps f32 so the
    1e-4 tolerance check against the f32 reference is meaningful.)
    """
    hidden, in_dim = w1.shape
    in_dim_pad = _round_up(in_dim, in_pad_multiple)

    w1_t = jnp.asarray(w1).T                       # (in_dim, hidden)
    if in_dim_pad != in_dim:
        w1_t = jnp.pad(w1_t, ((0, in_dim_pad - in_dim), (0, 0)))
    w2_t = jnp.asarray(w2).T                       # (hidden, hidden)
    b1_2d = jnp.asarray(b1).reshape(1, hidden)
    b2_2d = jnp.asarray(b2).reshape(1, hidden)

    if param_dtype is not None:
        w1_t = w1_t.astype(param_dtype)
        w2_t = w2_t.astype(param_dtype)
        b1_2d = b1_2d.astype(param_dtype)
        b2_2d = b2_2d.astype(param_dtype)
    return w1_t, b1_2d, w2_t, b2_2d


# --------------------------------- wrapper -----------------------------------

def mlp_embedder(x, params, *, tm=None, tn=512, mode="auto"):
    """x: (..., in_dim); params from prepare_mlp_embedder_params().
    Returns (..., hidden) in x.dtype.  mode in {"auto", "resident", "stream"}."""
    w1_t, b1_2d, w2_t, b2_2d = params
    lead = x.shape[:-1]
    in_dim = x.shape[-1]
    in_dim_pad, hidden = w1_t.shape
    M = 1
    for d in lead:
        M *= d

    abytes = jnp.dtype(x.dtype).itemsize
    wbytes = jnp.dtype(w2_t.dtype).itemsize

    vmem_cap, kind = _tpu_caps()
    budget = int(vmem_cap * 0.8)                       # ~20% headroom
    is_v7x = "v7" in kind
    is_v5e = ("v5e" in kind) or ("v5 lite" in kind) or ("v5lite" in kind)

    # Conservative (2x = possible double-buffering of every spec) working sets.
    def _resident_bytes(tm_):
        fixed = 2 * (in_dim_pad * hidden + hidden * hidden + 2 * hidden) * wbytes
        return fixed + 2 * tm_ * (in_dim_pad + hidden) * abytes

    def _stream_bytes(tm_, tn_):
        return (2 * tm_ * in_dim_pad * abytes              # x tiles
                + 2 * in_dim_pad * hidden * wbytes          # W1 (resident)
                + 4 * hidden * wbytes                       # biases
                + 2 * hidden * tn_ * wbytes                 # W2 column slabs
                + 2 * tm_ * tn_ * abytes                    # out tiles
                + tm_ * hidden * wbytes)                    # h scratch

    if mode == "resident":
        use_resident = True
    elif mode == "stream":
        use_resident = False
    else:
        use_resident = _resident_bytes(8) <= budget

    # --- M tiling: balanced tiles, minimal padding ---
    if tm is not None:
        tm_target = tm
    elif use_resident:
        tm_target = 256 if is_v7x else 512
    else:
        # Streaming W2: tm must be large enough that per-step MXU work covers
        # the W2 slab DMA (peak_flops / HBM_BW).
        tm_target = 256 if is_v5e else (384 if is_v7x else 768)

    n_tiles = max(1, _cdiv(M, tm_target))
    if use_resident and is_v7x and n_tiles < 2 and M > 8:
        n_tiles = 2                                   # feed both v7x TensorCores
    tm_ = _round_up(_cdiv(M, n_tiles), 8)

    if use_resident:
        tn_ = hidden
        while tm_ > 8 and _resident_bytes(tm_) > budget:
            tm_ = _round_up(_cdiv(tm_, 2), 8)
        needed = _resident_bytes(tm_)
    else:
        tn_ = _pick_tile(hidden, tn, 128)
        while tm_ > 8 and _stream_bytes(tm_, tn_) > budget:
            tm_ = _round_up(_cdiv(tm_, 2), 8)
        while tn_ >= 256 and tn_ % 256 == 0 and _stream_bytes(tm_, tn_) > budget:
            tn_ //= 2
        needed = _stream_bytes(tm_, tn_)

    m_pad = _round_up(M, tm_)

    x2d = x.reshape(M, in_dim)
    pad_m = m_pad - M
    pad_d = in_dim_pad - in_dim
    if pad_m or pad_d:
        x2d = jnp.pad(x2d, ((0, pad_m), (0, pad_d)))

    vmem_limit = min(max(int(needed) + (4 << 20), 32 << 20),
                     int(vmem_cap * 0.9))

    if use_resident:
        out2d = pl.pallas_call(
            _mlp_embedder_resident_kernel,
            out_shape=jax.ShapeDtypeStruct((m_pad, hidden), x.dtype),
            grid_spec=pltpu.PrefetchScalarGridSpec(
                num_scalar_prefetch=0,
                grid=(m_pad // tm_,),
                in_specs=[
                    pl.BlockSpec((tm_, in_dim_pad), lambda i: (i, 0)),     # x
                    pl.BlockSpec((in_dim_pad, hidden), lambda i: (0, 0)),  # W1
                    pl.BlockSpec((1, hidden), lambda i: (0, 0)),           # b1
                    pl.BlockSpec((hidden, hidden), lambda i: (0, 0)),      # W2
                    pl.BlockSpec((1, hidden), lambda i: (0, 0)),           # b2
                ],
                out_specs=pl.BlockSpec((tm_, hidden), lambda i: (i, 0)),
            ),
            compiler_params=pltpu.CompilerParams(
                dimension_semantics=("parallel",),
                vmem_limit_bytes=vmem_limit,
            ),
        )(x2d, w1_t, b1_2d, w2_t, b2_2d)
    else:
        grid = (m_pad // tm_, hidden // tn_)
        out2d = pl.pallas_call(
            _mlp_embedder_stream_kernel,
            out_shape=jax.ShapeDtypeStruct((m_pad, hidden), x.dtype),
            grid_spec=pltpu.PrefetchScalarGridSpec(
                num_scalar_prefetch=0,
                grid=grid,
                in_specs=[
                    pl.BlockSpec((tm_, in_dim_pad), lambda i, j: (i, 0)),     # x
                    pl.BlockSpec((in_dim_pad, hidden), lambda i, j: (0, 0)),  # W1
                    pl.BlockSpec((1, hidden), lambda i, j: (0, 0)),           # b1
                    pl.BlockSpec((hidden, tn_), lambda i, j: (0, j)),         # W2 slab
                    pl.BlockSpec((1, tn_), lambda i, j: (0, j)),              # b2 slab
                ],
                out_specs=pl.BlockSpec((tm_, tn_), lambda i, j: (i, j)),
                # h scratch persists across grid steps; see grid-order invariant
                # comment at the top of this file.
                scratch_shapes=[pltpu.VMEM((tm_, hidden), w2_t.dtype)],
            ),
            compiler_params=pltpu.CompilerParams(
                dimension_semantics=("parallel", "arbitrary"),
                vmem_limit_bytes=vmem_limit,
            ),
        )(x2d, w1_t, b1_2d, w2_t, b2_2d)

    if m_pad != M:
        out2d = out2d[:M]
    return out2d.reshape(lead + (hidden,))


# --------------------------------- reference ----------------------------------

def _reference(x, w1, b1, w2, b2):
    h = jnp.einsum("...d,hd->...h", x, w1) + b1
    h = h * jax.nn.sigmoid(h)
    return jnp.einsum("...h,oh->...o", h, w2) + b2


if __name__ == "__main__":
    key = jax.random.PRNGKey(0)

    # ---- Test 1: small shapes, auto (VMEM-resident) path ----
    batch, seq, in_dim, hidden = 2, 8, 32, 128
    kx, kw1, kb1, kw2, kb2, k2 = jax.random.split(key, 6)

    x = jax.random.normal(kx, (batch, seq, in_dim), dtype=jnp.float32)
    # Torch Linear layout: (out, in).
    w1 = jax.random.normal(kw1, (hidden, in_dim), dtype=jnp.float32) * 0.05
    b1 = jax.random.normal(kb1, (hidden,), dtype=jnp.float32) * 0.05
    w2 = jax.random.normal(kw2, (hidden, hidden), dtype=jnp.float32) * 0.05
    b2 = jax.random.normal(kb2, (hidden,), dtype=jnp.float32) * 0.05

    # Keep f32 here so the 1e-4 tolerance check is meaningful; in production
    # pass param_dtype=jnp.bfloat16.
    params = prepare_mlp_embedder_params(w1, b1, w2, b2)

    out = mlp_embedder(x, params)
    jax.block_until_ready(out)
    ref = _reference(x, w1, b1, w2, b2)
    assert out.shape == (batch, seq, hidden)
    assert jnp.allclose(out, ref, atol=1e-4, rtol=1e-4)

    # ---- Test 2: force the streaming-W2 fallback (multi N tiles, M padding,
    #              padded in_dim) so that code path is also exercised ----
    b2_, s2_, d2_, h2_ = 2, 65, 48, 256
    kx2, kw1b, kb1b, kw2b, kb2b = jax.random.split(k2, 5)
    x2 = jax.random.normal(kx2, (b2_, s2_, d2_), dtype=jnp.float32)
    w1b = jax.random.normal(kw1b, (h2_, d2_), dtype=jnp.float32) * 0.05
    b1b = jax.random.normal(kb1b, (h2_,), dtype=jnp.float32) * 0.05
    w2b = jax.random.normal(kw2b, (h2_, h2_), dtype=jnp.float32) * 0.05
    b2b = jax.random.normal(kb2b, (h2_,), dtype=jnp.float32) * 0.05
    params2 = prepare_mlp_embedder_params(w1b, b1b, w2b, b2b)

    out2 = mlp_embedder(x2, params2, mode="stream", tn=128)
    jax.block_until_ready(out2)
    ref2 = _reference(x2, w1b, b1b, w2b, b2b)
    assert out2.shape == (b2_, s2_, h2_)
    assert jnp.allclose(out2, ref2, atol=1e-4, rtol=1e-4)

    print("KERNEL_OK")
</pallas_src>

<mosaic_0001>
module attributes {stable_mosaic.version = 11 : i64} {
  func.func @_mlp_embedder_resident_kernel(%arg0: i32, %arg1: memref<16x128xf32, #tpu.memory_space<vmem>>, %arg2: memref<128x128xf32, #tpu.memory_space<vmem>>, %arg3: memref<1x128xf32, #tpu.memory_space<vmem>>, %arg4: memref<128x128xf32, #tpu.memory_space<vmem>>, %arg5: memref<1x128xf32, #tpu.memory_space<vmem>>, %arg6: memref<16x128xf32, #tpu.memory_space<vmem>>) attributes {dimension_semantics = [#tpu.dimension_semantics<parallel>], iteration_bounds = array<i64: 1>, scalar_prefetch = 0 : i64, scratch_operands = 0 : i64, tpu.core_type = #tpu.core_type<tc>, window_params = [{transform_indices = @transform_0, window_bounds = array<i64: 16, 128>}, {pipeline_mode = #tpu.pipeline_mode<synchronous>, transform_indices = @transform_1, window_bounds = array<i64: 128, 128>}, {pipeline_mode = #tpu.pipeline_mode<synchronous>, transform_indices = @transform_2, window_bounds = array<i64: 1, 128>}, {pipeline_mode = #tpu.pipeline_mode<synchronous>, transform_indices = @transform_3, window_bounds = array<i64: 128, 128>}, {pipeline_mode = #tpu.pipeline_mode<synchronous>, transform_indices = @transform_4, window_bounds = array<i64: 1, 128>}, {transform_indices = @transform_5, window_bounds = array<i64: 16, 128>}]} {
    %c0 = arith.constant 0 : index
    %c0_0 = arith.constant 0 : index
    %0 = vector.load %arg1[%c0, %c0_0] : memref<16x128xf32, #tpu.memory_space<vmem>>, vector<16x128xf32>
    %c0_1 = arith.constant 0 : index
    %c0_2 = arith.constant 0 : index
    %1 = vector.load %arg2[%c0_1, %c0_2] : memref<128x128xf32, #tpu.memory_space<vmem>>, vector<128x128xf32>
    %cst = arith.constant dense<0.000000e+00> : vector<16x128xf32>
    %2 = tpu.matmul %0, %1, %cst {dimension_numbers = #tpu.dot_dimension_numbers<[1], [0], [0], [1], [0, 0, 1, 1], [], []>} : vector<16x128xf32>, vector<128x128xf32>, vector<16x128xf32> -> vector<16x128xf32>
    %c0_3 = arith.constant 0 : index
    %c0_4 = arith.constant 0 : index
    %3 = vector.load %arg3[%c0_3, %c0_4] : memref<1x128xf32, #tpu.memory_space<vmem>>, vector<1x128xf32>
    %4 = vector.broadcast %3 : vector<1x128xf32> to vector<16x128xf32>
    %5 = arith.addf %2, %4 : vector<16x128xf32>
    %6 = arith.negf %5 : vector<16x128xf32>
    %7 = math.exp %6 : vector<16x128xf32>
    %cst_5 = arith.constant 1.000000e+00 : f32
    %8 = vector.broadcast %cst_5 : f32 to vector<16x128xf32>
    %9 = arith.addf %8, %7 : vector<16x128xf32>
    %10 = arith.divf %8, %9 : vector<16x128xf32>
    %11 = arith.mulf %5, %10 : vector<16x128xf32>
    %c0_6 = arith.constant 0 : index
    %c0_7 = arith.constant 0 : index
    %12 = vector.load %arg4[%c0_6, %c0_7] : memref<128x128xf32, #tpu.memory_space<vmem>>, vector<128x128xf32>
    %cst_8 = arith.constant dense<0.000000e+00> : vector<16x128xf32>
    %13 = tpu.matmul %11, %12, %cst_8 {dimension_numbers = #tpu.dot_dimension_numbers<[1], [0], [0], [1], [0, 0, 1, 1], [], []>} : vector<16x128xf32>, vector<128x128xf32>, vector<16x128xf32> -> vector<16x128xf32>
    %c0_9 = arith.constant 0 : index
    %c0_10 = arith.constant 0 : index
    %14 = vector.load %arg5[%c0_9, %c0_10] : memref<1x128xf32, #tpu.memory_space<vmem>>, vector<1x128xf32>
    %15 = vector.broadcast %14 : vector<1x128xf32> to vector<16x128xf32>
    %16 = arith.addf %13, %15 : vector<16x128xf32>
    %c0_11 = arith.constant 0 : index
    %c0_12 = arith.constant 0 : index
    %17 = vector.load %arg6[%c0_11, %c0_12] : memref<16x128xf32, #tpu.memory_space<vmem>>, vector<16x128xf32>
    tpu.vector_store %arg6[%c0_11, %c0_12], %16 {strides = array<i32>} : memref<16x128xf32, #tpu.memory_space<vmem>>, vector<16x128xf32>,
    return
  }
  func.func @transform_0(%arg0: i32) -> (i32, i32) {
    %c0_i32 = arith.constant 0 : i32
    %c0_i32_0 = arith.constant 0 : i32
    return %arg0, %c0_i32 : i32, i32
  }
  func.func @transform_1(%arg0: i32) -> (i32, i32) {
    %c0_i32 = arith.constant 0 : i32
    %c0_i32_0 = arith.constant 0 : i32
    %c0_i32_1 = arith.constant 0 : i32
    return %c0_i32, %c0_i32_0 : i32, i32
  }
  func.func @transform_2(%arg0: i32) -> (i32, i32) {
    %c0_i32 = arith.constant 0 : i32
    %c0_i32_0 = arith.constant 0 : i32
    %c0_i32_1 = arith.constant 0 : i32
    return %c0_i32, %c0_i32_0 : i32, i32
  }
  func.func @transform_3(%arg0: i32) -> (i32, i32) {
    %c0_i32 = arith.constant 0 : i32
    %c0_i32_0 = arith.constant 0 : i32
    %c0_i32_1 = arith.constant 0 : i32
    return %c0_i32, %c0_i32_0 : i32, i32
  }
  func.func @transform_4(%arg0: i32) -> (i32, i32) {
    %c0_i32 = arith.constant 0 : i32
    %c0_i32_0 = arith.constant 0 : i32
    %c0_i32_1 = arith.constant 0 : i32
    return %c0_i32, %c0_i32_0 : i32, i32
  }
  func.func @transform_5(%arg0: i32) -> (i32, i32) {
    %c0_i32 = arith.constant 0 : i32
    %c0_i32_0 = arith.constant 0 : i32
    return %arg0, %c0_i32 : i32, i32
  }
}

</mosaic_0001>

<bundles_post_ra>
// kernel: tpu_custom_call.1
= control target key start
LH: loop header
LB: loop body
LE: loop exit
PB: predicated region body
PF: predicated region fallthrough
CT: control target
= control target key end

     0   :  { %10 = vsyncpa [#allocation3], 0  ;;  %s436_s0 = inlined_call_operand.hbm [shape: f32[16,128], index: 0, kind: input, shape index: {}]   ;;  %s437_s1 = inlined_call_operand.hbm [shape: f32[128,128], index: 1, kind: input, shape index: {}]   ;;  %s438_s2 = inlined_call_operand.vmem [shape: f32[1,128], index: 2, kind: input, shape index: {}]   ;;  %s439_s3 = inlined_call_operand.hbm [shape: f32[128,128], index: 3, kind: input, shape index: {}]   ;;  %s440_s4 = inlined_call_operand.vmem [shape: f32[1,128], index: 4, kind: input, shape index: {}]   ;;  %s441_s5 = inlined_call_operand.hbm [shape: f32[16,128], index: 5, kind: output, shape index: {}]  }
   0x1   :  { %11 = vsyncpa [#allocation6], 0 }
   0x2   :  { %12 = vsyncpa [#allocation4], 0  ;;  %s30_s20 = sshll.u32 %s437_s1, 4  ;;  %s370_s21 = smov [#allocation5]   ;;  %s31_s20 = int_to_ptr.hbm [resolvable:$true] %s30_s20 }
   0x3   :  { %s32_s22 = sshll.u32 %s370_s21, 4  ;;  %s17_s25 = sshll.u32 %s436_s0, 4  ;;  %s33_s22 = int_to_ptr.vmem [resolvable:$true] %s32_s22  ;;  %s18_s25 = int_to_ptr.hbm [resolvable:$true] %s17_s25 }
   0x4   :  { %s371_s26 = smov 128   ;;  %s372_s27 = smov 8  }
   0x5   :  { %38 = dma.hbm_to_vmem [thread:$0]  %s31_s20, 2048, %s33_s22, [#allocation6], %s371_s26, %s371_s26, %s372_s27  }
   0x6   :  { %s373_s28 = smov [#allocation2]   ;;  %s45_s1 = sshll.u32 %s439_s3, 4  ;;  %s46_s1 = int_to_ptr.hbm [resolvable:$true] %s45_s1 }
   0x7   :  { %s19_s29 = sshll.u32 %s373_s28, 4  ;;  %s374_s0 = smov [#allocation7]   ;;  %s20_s29 = int_to_ptr.vmem [resolvable:$true] %s19_s29 }
   0x8   :  { %25 = dma.hbm_to_vmem [thread:$0]  %s18_s25, 256, %s20_s29, [#allocation3], %s371_s26, %s371_s26, %s372_s27  }
   0x9   :  { %s47_s7 = sshll.u32 %s374_s0, 4  ;;  %s48_s7 = int_to_ptr.vmem [resolvable:$true] %s47_s7 }
   0xa   :  { %53 = dma.hbm_to_vmem [thread:$0]  %s46_s1, 2048, %s48_s7, [#allocation6], %s371_s26, %s371_s26, %s372_s27  }
   0xb   :  { %364 = dma.done.wait [#allocation3], 256  }
   0xc   :  { %365 = vsyncadd [#allocation3], 4294967040 }
   0xd   :  { %366 = dma.done.wait [#allocation6], 4096  }
   0xe   :  { %367 = vsyncadd [#allocation6], 4294963200  ;;  %v85_v0 = vld [vmem:[#allocation5 + $0x78] sm:$0xff]  ;;  %v84_v1 = vld [vmem:[#allocation5 + $0x70] sm:$0xff]  ;;  %s375_s10 = smov [#allocation8]   ;;  %s204_s14 = sshll.u32 %s441_s5, 4  ;;  %s205_s14 = int_to_ptr.hbm [resolvable:$true] %s204_s14 }
   0xf   :  { %90 = vmatpush.msra.mxu0 %v85_v0  ;;  %220 = vmatpush.msra.mxu2 %v85_v0  ;;  %v83_v2 = vld [vmem:[#allocation5 + $0x68] sm:$0xff]  ;;  %v82_v3 = vld [vmem:[#allocation5 + $0x60] sm:$0xff]  ;;  %v81_v4 = vld [vmem:[#allocation5 + $0x58] sm:$0xff]  ;;  %s202_s11 = sshll.u32 %s375_s10, 4  ;;  %s203_s11 = int_to_ptr.vmem [resolvable:$true] %s202_s11 }
  0x10   :  { %v80_v5 = vld [vmem:[#allocation5 + $0x50] sm:$0xff]  ;;  %v79_v6 = vld [vmem:[#allocation5 + $0x48] sm:$0xff]  ;;  %v78_v7 = vld [vmem:[#allocation5 + $0x40] sm:$0xff] }
  0x11   :  { %91 = vmatpush.msra.mxu0 %v84_v1  ;;  %221 = vmatpush.msra.mxu2 %v84_v1  ;;  %v77_v8 = vld [vmem:[#allocation5 + $0x38] sm:$0xff]  ;;  %v76_v9 = vld [vmem:[#allocation5 + $0x30] sm:$0xff]  ;;  %v75_v10 = vld [vmem:[#allocation5 + $0x28] sm:$0xff] }
  0x12   :  { %v74_v11 = vld [vmem:[#allocation5 + $0x20] sm:$0xff]  ;;  %v73_v12 = vld [vmem:[#allocation5 + $0x18] sm:$0xff]  ;;  %v72_v13 = vld [vmem:[#allocation5 + $0x10] sm:$0xff] }
  0x13   :  { %92 = vmatpush.msra.mxu0 %v83_v2  ;;  %222 = vmatpush.msra.mxu2 %v83_v2  ;;  %v71_v14 = vld [vmem:[#allocation5 + $0x8] sm:$0xff]  ;;  %v70_v15 = vld [vmem:[#allocation5] sm:$0xff]  ;;  %v68_v16 = vld [vmem:[#allocation2] sm:$0xff] }
  0x14   :  { %v69_v17 = vld [vmem:[#allocation2 + $0x8] sm:$0xff]  ;;  %v167_v19 = vld [vmem:[#allocation7 + $0x70] sm:$0xff]  ;;  %v166_v20 = vld [vmem:[#allocation7 + $0x68] sm:$0xff] }
  0x15   :  { %93 = vmatpush.msra.mxu0 %v82_v3  ;;  %223 = vmatpush.msra.mxu2 %v82_v3  ;;  %v168_v18 = vld [vmem:[#allocation7 + $0x78] sm:$0xff]  ;;  %v165_v21 = vld [vmem:[#allocation7 + $0x60] sm:$0xff]  ;;  %v163_v23 = vld [vmem:[#allocation7 + $0x50] sm:$0xff] }
  0x16   :  { %173 = vmatpush.msra.mxu1 %v168_v18  ;;  %236 = vmatpush.msra.mxu3 %v168_v18  ;;  %v164_v22 = vld [vmem:[#allocation7 + $0x58] sm:$0xff]  ;;  %v162_v24 = vld [vmem:[#allocation7 + $0x48] sm:$0xff]  ;;  %v161_v25 = vld [vmem:[#allocation7 + $0x40] sm:$0xff] }
  0x17   :  { %94 = vmatpush.msra.mxu0 %v81_v4  ;;  %224 = vmatpush.msra.mxu2 %v81_v4  ;;  %v160_v26 = vld [vmem:[#allocation7 + $0x38] sm:$0xff]  ;;  %v159_v27 = vld [vmem:[#allocation7 + $0x30] sm:$0xff]  ;;  %v158_v28 = vld [vmem:[#allocation7 + $0x28] sm:$0xff] }
  0x18   :  { %174 = vmatpush.msra.mxu1 %v167_v19  ;;  %237 = vmatpush.msra.mxu3 %v167_v19  ;;  %v157_v29 = vld [vmem:[#allocation7 + $0x20] sm:$0xff]  ;;  %v156_v30 = vld [vmem:[#allocation7 + $0x18] sm:$0xff]  ;;  %v155_v31 = vld [vmem:[#allocation7 + $0x10] sm:$0xff] }
  0x19   :  { %95 = vmatpush.msra.mxu0 %v80_v5  ;;  %225 = vmatpush.msra.mxu2 %v80_v5  ;;  %v154_v32 = vld [vmem:[#allocation7 + $0x8] sm:$0xff]  ;;  %v258_v33 = vld [vmem:[%s438_s2] ss:$0 sm:$0xff]  ;;  %v153_v34 = vld [vmem:[#allocation7] sm:$0xff] }
  0x1a   :  { %175 = vmatpush.msra.mxu1 %v166_v20  ;;  %238 = vmatpush.msra.mxu3 %v166_v20  ;;  %v259_v3 = vld [vmem:[%s440_s4] ss:$0 sm:$0xff] }
  0x1b   :  { %96 = vmatpush.msra.mxu0 %v79_v6  ;;  %226 = vmatpush.msra.mxu2 %v79_v6 }
  0x1c   :  { %176 = vmatpush.msra.mxu1 %v165_v21  ;;  %239 = vmatpush.msra.mxu3 %v165_v21 }
  0x1d   :  { %97 = vmatpush.msra.mxu0 %v78_v7  ;;  %227 = vmatpush.msra.mxu2 %v78_v7 }
  0x1e   :  { %177 = vmatpush.msra.mxu1 %v164_v22  ;;  %240 = vmatpush.msra.mxu3 %v164_v22 }
  0x1f   :  { %98 = vmatpush.msra.mxu0 %v77_v8  ;;  %228 = vmatpush.msra.mxu2 %v77_v8 }
  0x20   :  { %178 = vmatpush.msra.mxu1 %v163_v23  ;;  %241 = vmatpush.msra.mxu3 %v163_v23 }
  0x21   :  { %99 = vmatpush.msra.mxu0 %v76_v9  ;;  %229 = vmatpush.msra.mxu2 %v76_v9 }
  0x22   :  { %179 = vmatpush.msra.mxu1 %v162_v24  ;;  %242 = vmatpush.msra.mxu3 %v162_v24 }
  0x23   :  { %100 = vmatpush.msra.mxu0 %v75_v10  ;;  %230 = vmatpush.msra.mxu2 %v75_v10 }
  0x24   :  { %180 = vmatpush.msra.mxu1 %v161_v25  ;;  %243 = vmatpush.msra.mxu3 %v161_v25 }
  0x25   :  { %101 = vmatpush.msra.mxu0 %v74_v11  ;;  %231 = vmatpush.msra.mxu2 %v74_v11 }
  0x26   :  { %181 = vmatpush.msra.mxu1 %v160_v26  ;;  %244 = vmatpush.msra.mxu3 %v160_v26 }
  0x27   :  { %102 = vmatpush.msra.mxu0 %v73_v12  ;;  %232 = vmatpush.msra.mxu2 %v73_v12 }
  0x28   :  { %182 = vmatpush.msra.mxu1 %v159_v27  ;;  %245 = vmatpush.msra.mxu3 %v159_v27 }
  0x29   :  { %103 = vmatpush.msra.mxu0 %v72_v13  ;;  %233 = vmatpush.msra.mxu2 %v72_v13 }
  0x2a   :  { %183 = vmatpush.msra.mxu1 %v158_v28  ;;  %246 = vmatpush.msra.mxu3 %v158_v28 }
  0x2b   :  { %104 = vmatpush.msra.mxu0 %v71_v14  ;;  %234 = vmatpush.msra.mxu2 %v71_v14 }
  0x2c   :  { %184 = vmatpush.msra.mxu1 %v157_v29  ;;  %247 = vmatpush.msra.mxu3 %v157_v29 }
  0x2d   :  { %105 = vmatpush.msra.mxu0 %v70_v15  ;;  %235 = vmatpush.msra.mxu2 %v70_v15 }
  0x2e   :  { %106 = vmatmul.f32.vlgmr.msra.gmra.mxu0 %v68_v16  ;;  %109 = vmatmul.f32.vlgmr.msra.gmra.mxu2 %v69_v17 }
  0x2f   :  { %185 = vmatpush.msra.mxu1 %v156_v30  ;;  %248 = vmatpush.msra.mxu3 %v156_v30 }
  0x31   :  { %186 = vmatpush.msra.mxu1 %v155_v31  ;;  %249 = vmatpush.msra.mxu3 %v155_v31 }
  0x33   :  { %187 = vmatpush.msra.mxu1 %v154_v32  ;;  %250 = vmatpush.msra.mxu3 %v154_v32 }
  0x35   :  { %188 = vmatpush.msra.mxu1 %v153_v34  ;;  %251 = vmatpush.msra.mxu3 %v153_v34 }
  0xab   :  { %v107_v35 = vpop.f32.mrf.mxu0 }
  0xac   :  { %v108_v36 = vadd.f32 %v258_v33, %v107_v35 }
  0xae   :  { %v218_v37 = vmul.f32 -1.442695, %v108_v36 }
  0xb0   :  { %260 = vpow2.f32 %v218_v37 }
  0xb1   :  { %v110_v38 = vpop.f32.mrf.mxu2 }
  0xb2   :  { %v111_v39 = vadd.f32 %v258_v33, %v110_v38 }
  0xb4   :  { %v219_v40 = vmul.f32 -1.442695, %v111_v39 }
  0xb6   :  { %v261_v41 = vpop.eup %260  ;;  %262 = vpow2.f32 %v219_v40 }
  0xb7   :  { %v119_v42 = vadd.f32 1.0, %v261_v41 }
  0xb9   :  { %264 = vrcp.f32 %v119_v42  ;;  %v132_v47 = vand.u32 2147483648, %v119_v42  ;;  %vm126_vm0 = vweird.f32 %v119_v42  ;;  %v130_v49 = vand.u32 2147483647, %v119_v42 }
  0xbb   :  { %v133_v52 = vor.u32 1.1754944e-38, %v132_v47  ;;  %vm131_vm3 = vcmp.eq.f32.partialorder %v130_v49, 8.507059e+37 }
  0xbc   :  { %v263_v43 = vpop.eup %262 }
  0xbd   :  { %v120_v44 = vadd.f32 1.0, %v263_v43 }
  0xbf   :  { %v265_v45 = vpop.eup %264  ;;  %266 = vrcp.f32 %v120_v44  ;;  %v147_v58 = vand.u32 2147483648, %v120_v44  ;;  %v145_v61 = vand.u32 2147483647, %v120_v44  ;;  %vm141_vm5 = vweird.f32 %v120_v44 }
  0xc0   :  { %v122_v46 = vmul.f32 %v265_v45, %v119_v42  ;;  %vm127_vm1 = vweird.f32 %v265_v45 }
  0xc1   :  { %vm128_vm2 = vmor %vm126_vm0, %vm127_vm1  ;;  %v148_v63 = vor.u32 1.1754944e-38, %v147_v58  ;;  %vm146_vm7 = vcmp.eq.f32.partialorder %v145_v61, 8.507059e+37 }
  0xc2   :  { %v123_v48 = vsub.f32 1.0, %v122_v46 }
  0xc4   :  { %v124_v50 = vmul.f32 %v265_v45, %v123_v48 }
  0xc5   :  { %v267_v51 = vpop.eup %266 }
  0xc6   :  { %v125_v53 = vadd.f32 %v265_v45, %v124_v50  ;;  %v137_v54 = vmul.f32 %v267_v51, %v120_v44  ;;  %vm142_vm4 = vweird.f32 %v267_v51 }
  0xc7   :  { %vm143_vm6 = vmor %vm141_vm5, %vm142_vm4 }
  0xc8   :  { %v129_v55 = vsel %vm128_vm2, %v265_v45, %v125_v53  ;;  %v138_v56 = vsub.f32 1.0, %v137_v54 }
  0xc9   :  { %v134_v57 = vsel %vm131_vm3, %v133_v52, %v129_v55 }
  0xca   :  { %v151_v59 = vmul.f32 %v134_v57, %v108_v36  ;;  %v139_v60 = vmul.f32 %v267_v51, %v138_v56 }
  0xcc   :  { %189 = vmatmul.f32.vlgmr.msra.gmra.mxu1 %v151_v59  ;;  %v140_v62 = vadd.f32 %v267_v51, %v139_v60 }
  0xce   :  { %v144_v0 = vsel %vm143_vm6, %v267_v51, %v140_v62 }
  0xcf   :  { %v149_v1 = vsel %vm146_vm7, %v148_v63, %v144_v0 }
  0xd0   :  { %v152_v2 = vmul.f32 %v149_v1, %v111_v39 }
  0xd2   :  { %192 = vmatmul.f32.vlgmr.msra.gmra.mxu3 %v152_v2 }
 0x149   :  { %v190_v4 = vpop.f32.mrf.mxu1 }
 0x14a   :  { %v191_v5 = vadd.f32 %v259_v3, %v190_v4 }
 0x14c   :  { %196 = vst [vmem:[#allocation8] sm:$0xff] %v191_v5 }
 0x155   :  { %v193_v6 = vpop.f32.mrf.mxu3 }
 0x156   :  { %v194_v7 = vadd.f32 %v259_v3, %v193_v6 }
 0x158   :  { %197 = vst [vmem:[#allocation8 + $0x8] sm:$0xff] %v194_v7 }
 0x159   :  { %210 = dma.vmem_to_hbm [thread:$0]  %s203_s11, 256, %s205_s14, [#allocation4], %s371_s26, %s371_s26, %s372_s27  }
 0x15a   :  { %368 = dma.done.wait [#allocation4], 256  }
 0x15b   :  { %369 = vsyncadd [#allocation4], 4294967040 }
 0x15c   :  { %215 = vsyncpa [#allocation3], 1 }
 0x15d   :  { %216 = vsyncpa [#allocation6], 1 }
 0x15e   :  { %217 = vsyncpa [#allocation4], 1 }

</bundles_post_ra>
